<compile_context>
chip_gen: v6e
topology: v6e:2x2x1
jax: 0.10.0
libtpu: 0.0.40
codegen_flags: <defaults>
</compile_context>

<pallas_src>
import jax
import jax.numpy as jnp
from jax.experimental import pallas as pl
from jax.experimental.pallas import tpu as pltpu


def _round_up(x, m):
    return ((x + m - 1) // m) * m


def bias_kernel(x_ref, b_ref, o_ref):
    # x_ref: (TN, F), b_ref: (1, F) -> broadcast add on the VPU.
    # jnp promotion inside the kernel handles e.g. bf16 x + f32 bias -> f32.
    o_ref[...] = (x_ref[...] + b_ref[...]).astype(o_ref.dtype)


def _chip_budget():
    """Return (tile_bytes, vmem_cap_bytes, num_tensorcores) per TPU generation."""
    vmem_bytes = None
    try:
        info = pltpu.get_tpu_info()
        vmem_bytes = getattr(info, "vmem_capacity_bytes", None)
    except Exception:
        vmem_bytes = None
    if vmem_bytes is not None and vmem_bytes > (96 << 20):
        # v5e / v6e: 128 MiB VMEM, 1 TensorCore per chip.
        return 16 << 20, 96 << 20, 1
    # v7x (or unknown -> conservative): 64 MiB per-TC VMEM, 2 TensorCores.
    return 12 << 20, 56 << 20, 2


def _bias_pallas(x, b2, out_dtype, *, donate_x=False):
    N, F = x.shape
    in_bytes = jnp.dtype(x.dtype).itemsize
    out_bytes = jnp.dtype(out_dtype).itemsize
    row_bytes = F * max(in_bytes, out_bytes)

    tile_bytes, vmem_cap, num_cores = _chip_budget()

    # Row tile sized for the HBM roofline, multiple of 8 sublanes.
    tn = max(8, (tile_bytes // row_bytes) // 8 * 8)
    tn = min(tn, _round_up(N, 8))
    # On multi-TensorCore chips keep at least `num_cores` grid steps (when the
    # batch allows) so the "parallel" axis can be sharded across cores.
    if num_cores > 1 and N >= 8 * num_cores and pl.cdiv(N, tn) < num_cores:
        tn = _round_up(pl.cdiv(N, num_cores), 8)
    grid = (pl.cdiv(N, tn),)

    # VMEM budget: double-buffered input + output tiles + bias + headroom.
    tile_vmem = tn * F * (in_bytes + out_bytes)
    vmem_limit = 2 * tile_vmem + 2 * F * (in_bytes + out_bytes) + (1 << 20)
    vmem_limit = int(min(vmem_cap, max(8 << 20, vmem_limit)))

    cost = pl.CostEstimate(
        flops=N * F,
        transcendentals=0,
        bytes_accessed=N * F * in_bytes + N * F * out_bytes + F * in_bytes,
    )

    io_aliases = {}
    if donate_x and jnp.dtype(x.dtype) == jnp.dtype(out_dtype):
        io_aliases = {0: 0}  # write the result in place of (donated) x

    return pl.pallas_call(
        bias_kernel,
        out_shape=jax.ShapeDtypeStruct((N, F), out_dtype),
        grid=grid,
        in_specs=[
            pl.BlockSpec((tn, F), lambda i: (i, 0)),   # batch tile of the input
            pl.BlockSpec((1, F), lambda i: (0, 0)),    # same bias every step
        ],
        out_specs=pl.BlockSpec((tn, F), lambda i: (i, 0)),
        compiler_params=pltpu.CompilerParams(
            dimension_semantics=("parallel",),
            vmem_limit_bytes=vmem_limit,
        ),
        cost_estimate=cost,
        input_output_aliases=io_aliases,
    )(x, b2)


def bias_forward(x, bias, *, min_pallas_bytes=1 << 20, force_pallas=False,
                 donate_x=False):
    """dlshogi Bias forward: x (N, F) + bias (F,), bias broadcast over N.

    Output dtype follows PyTorch type promotion (result_type of x and bias).
    """
    N, F = x.shape
    assert bias.shape == (F,)
    out_dtype = jnp.result_type(x.dtype, bias.dtype)
    in_bytes = jnp.dtype(x.dtype).itemsize

    # Tiny inputs: pallas_call launch + DMA setup dwarfs the add. Let XLA fuse.
    if not force_pallas and N * F * in_bytes <= min_pallas_bytes:
        return (x + bias[None, :]).astype(out_dtype)

    b2 = bias.reshape(1, F)
    return _bias_pallas(x, b2, out_dtype, donate_x=donate_x)


if __name__ == "__main__":
    key = jax.random.PRNGKey(0)
    kx, kb, kx2 = jax.random.split(key, 3)

    # Shapes consistent with dlshogi policy head: feature dim 9*9*27 = 2187.
    F = 9 * 9 * 27
    bias = jax.random.normal(kb, (F,), dtype=jnp.float32)

    # 1) Small batch -> dispatcher bypasses Pallas (plain fused broadcast-add).
    N_small = 8
    x_small = jax.random.normal(kx, (N_small, F), dtype=jnp.float32)
    out_small = jax.block_until_ready(bias_forward(x_small, bias))
    ref_small = x_small + bias[None, :]
    assert out_small.shape == ref_small.shape and out_small.dtype == ref_small.dtype
    assert jnp.allclose(out_small, ref_small, atol=1e-6, rtol=1e-6)

    # 2) Exercise the Pallas kernel path on the unpadded F = 2187 layout
    #    (full-F last-dim block, no pad/slice round-trip) at a small batch.
    N_med = 64
    x_med = jax.random.normal(kx2, (N_med, F), dtype=jnp.float32)
    out_med = jax.block_until_ready(bias_forward(x_med, bias, force_pallas=True))
    ref_med = x_med + bias[None, :]
    assert out_med.shape == ref_med.shape and out_med.dtype == ref_med.dtype
    assert jnp.allclose(out_med, ref_med, atol=1e-6, rtol=1e-6)

    print("KERNEL_OK")
</pallas_src>

<mosaic_0001>
module attributes {stable_mosaic.version = 11 : i64} {
  func.func @bias_kernel(%arg0: i32, %arg1: memref<32x2187xf32, #tpu.memory_space<vmem>>, %arg2: memref<1x2187xf32, #tpu.memory_space<vmem>>, %arg3: memref<32x2187xf32, #tpu.memory_space<vmem>>) attributes {dimension_semantics = [#tpu.dimension_semantics<parallel>], iteration_bounds = array<i64: 2>, scalar_prefetch = 0 : i64, scratch_operands = 0 : i64, tpu.core_type = #tpu.core_type<tc>, window_params = [{transform_indices = @transform_0, window_bounds = array<i64: 32, 2187>}, {pipeline_mode = #tpu.pipeline_mode<synchronous>, transform_indices = @transform_1, window_bounds = array<i64: 1, 2187>}, {transform_indices = @transform_2, window_bounds = array<i64: 32, 2187>}]} {
    %c0 = arith.constant 0 : index
    %c0_0 = arith.constant 0 : index
    %0 = vector.load %arg1[%c0, %c0_0] : memref<32x2187xf32, #tpu.memory_space<vmem>>, vector<32x2187xf32>
    %c0_1 = arith.constant 0 : index
    %c0_2 = arith.constant 0 : index
    %1 = vector.load %arg2[%c0_1, %c0_2] : memref<1x2187xf32, #tpu.memory_space<vmem>>, vector<1x2187xf32>
    %2 = vector.broadcast %1 : vector<1x2187xf32> to vector<32x2187xf32>
    %3 = arith.addf %0, %2 : vector<32x2187xf32>
    %c0_3 = arith.constant 0 : index
    %c0_4 = arith.constant 0 : index
    %4 = vector.load %arg3[%c0_3, %c0_4] : memref<32x2187xf32, #tpu.memory_space<vmem>>, vector<32x2187xf32>
    tpu.vector_store %arg3[%c0_3, %c0_4], %3 {strides = array<i32>} : memref<32x2187xf32, #tpu.memory_space<vmem>>, vector<32x2187xf32>,
    return
  }
  func.func @transform_0(%arg0: i32) -> (i32, i32) {
    %c0_i32 = arith.constant 0 : i32
    %c0_i32_0 = arith.constant 0 : i32
    return %arg0, %c0_i32 : i32, i32
  }
  func.func @transform_1(%arg0: i32) -> (i32, i32) {
    %c0_i32 = arith.constant 0 : i32
    %c0_i32_0 = arith.constant 0 : i32
    %c0_i32_1 = arith.constant 0 : i32
    return %c0_i32, %c0_i32_0 : i32, i32
  }
  func.func @transform_2(%arg0: i32) -> (i32, i32) {
    %c0_i32 = arith.constant 0 : i32
    %c0_i32_0 = arith.constant 0 : i32
    return %arg0, %c0_i32 : i32, i32
  }
}

</mosaic_0001>

<bundles_post_ra>
// kernel: tpu_custom_call.1
= control target key start
LH: loop header
LB: loop body
LE: loop exit
PB: predicated region body
PF: predicated region fallthrough
CT: control target
= control target key end

     0   :  { %7 = vsyncpa [#allocation3], 0  ;;  %s1272_s0 = inlined_call_operand.hbm [shape: f32[64,2187], index: 0, kind: input, shape index: {}]   ;;  %s1273_s1 = inlined_call_operand.hbm [shape: f32[1,2187], index: 1, kind: input, shape index: {}]   ;;  %s1274_s2 = inlined_call_operand.hbm [shape: f32[64,2187], index: 2, kind: output, shape index: {}]  }
   0x1   :  { %9 = vsyncpa [#allocation3 + $0x1], 0 }
   0x2   :  { %10 = vsyncpa [#allocation6], 0 }
   0x3   :  { %11 = vsyncpa [#allocation4], 0 }
   0x4   :  { %13 = vsyncpa [#allocation4 + $0x1], 0  ;;  %s814_s9 = smov 0   ;;  %s816_s10 = smov 0  }
   0x5   :  { %s818_s11 = smov 0   ;;  %s820_s12 = smov 0  }
   0x6 LB: > { %s835_s13 = sadd.s32 4294967295, %s790_s12   ;;  %s589_s14 = sadd.s32 4294967294, %s790_s12   ;;  %s790_s12 = sphi %s820_s12, %s1297_s12   ;;  %s786_s11 = sphi %s818_s11, %s1296_s11   ;;  %s782_s10 = sphi %s816_s10, %s1295_s10   ;;  %s778_s9 = sphi %s814_s9, %s1294_s9  }
   0x7   : > { %s839_s15 = sadd.s32 1, %s790_s12   ;;  %s26_s16 = sadd.s32 1, %s786_s11 }
   0x8   : > { %s23_s17 = ssub.s32 %s790_s12, %s839_s15  ;;  %p33_p0 = scmp.ne.s32.totalorder %s786_s11, %s782_s10 }
   0x9   : > { %p24_p1 = scmp.eq.s32.totalorder %s23_s17, 0  ;;  %p34_p2 = scmp.eq.s32.totalorder %s790_s12, 0 }
   0xa   : > { %p39_p3 = scmp.ne.s32.totalorder %s782_s10, %s778_s9  ;;  %p1275_p4 = scmp.eq.s32.totalorder %s835_s13, 0 }
   0xb   : > { %s851_s18 = scalar_select %p24_p1, %s786_s11, %s26_s16  }
   0xc   : > { %p853_p5 = por %p34_p2, %p33_p0  ;;  %p859_p6 = por %p1275_p4, %p39_p3 }
   0xd   : > { %p84_p7 = scmp.eq.s32.totalorder %s835_s13, 1  ;;  %p90_p8 = scmp.eq.s32.totalorder %s589_s14, 1 }
   0xe   : > { %s1280_s20 = scalar_select %p859_p6, 1, 0 }
   0xf   : > { %p590_p9 = scmp.ge.s32.totalorder %s790_s12, 1  ;;  %p97_p10 = scmp.lt.s32.totalorder %s790_s12, 3 }
  0x10   : > { %p866_p11 = por %p84_p7, %p33_p0  ;;  %p870_p12 = por %p90_p8, %p39_p3 }
  0x11   : > { %p874_p13 = pnand %p590_p9, %p97_p10  ;;  %s792_s24 = smov [#allocation5]  }
  0x12   : > { %s1281_s21 = scalar_select %p866_p11, 1, 0 }
  0x13   : > { %s1282_s22 = scalar_select %p870_p12, 1, 0 }
  0x14   : > { %s1283_s23 = scalar_select %p874_p13, 1, 0 }
  0x15   : > { %p615_p2 = pneg %p874_p13  ;;  %s110_s25 = sshll.u32 %s792_s24, 4  ;;  %s111_s25 = int_to_ptr.vmem [resolvable:$true] %s110_s25 }
  0x16   : > { %p628_p4 = scmp.lt.s32.totalorder %s790_s12, 2  ;;  %p1284_p0 = scmp.eq.s32.totalorder %s835_s13, 0 }
  0x17   : > { %s121_s27 = sand.u32 1, %s786_s11   ;;  %s679_s30 = scalar_lea.vmem %s111_s25, 288 }
  0x18   : > { %p884_p7 = pnand %p615_p2, %p1284_p0  ;;  %p891_p3 = pnand %p628_p4, %p853_p5 }
  0x19   : > { %s603_s29 = smul.u32 576, %s121_s27  ;;  %p680_p9 = scmp.ne.s32.totalorder %s111_s25, %s679_s30 }
  0x1a   : > { %p670_p8 = pneg %p884_p7  ;;  %p687_p12 = scmp.lt.s32.totalorder %s111_s25, %s111_s25 }
  0x1b   : > { %p688_p11 = scmp.lt.s32.totalorder %s679_s30, %s679_s30 }
  0x1c   : > { %p682_p10 = pnand %p680_p9, %p670_p8 }
  0x1d   : > { %p689_p2 = por %p688_p11, %p687_p12 }
  0x1e   : > { %p683_p1 = pneg %p682_p10 }
  0x20   : > { %p690_p0 = pnand %p689_p2, %p683_p1 }
  0x22   : > { %693 = shalt.err (!%p690_p0)
}
  0x23   : > { %618 = dma.hbm_to_vmem [thread:$0]  (!%p884_p7), %s1273_s1, 288, %s111_s25, [#allocation6]  }
  0x24   : > { %s604_s5 = smul.u32 9216, %s790_s12  ;;  %s125_s6 = scalar_lea.vmem [#allocation2], %s603_s29 }
  0x25   : > { %s133_s7 = sshll.u32 %s125_s6, 4  ;;  %s910_s17 = scalar_lea.sflag [#allocation3], %s121_s27  ;;  %s903_s7 = int_to_ptr.vmem [resolvable:$true] %s133_s7 }
  0x26   : > { %s908_s16 = scalar_lea.hbm %s1272_s0, %s604_s5  ;;  %p696_p5 = pneg %p891_p3 }
  0x27   : > { %s694_s19 = scalar_lea.hbm %s908_s16, 9216  ;;  %s699_s26 = scalar_lea.hbm %s1272_s0, 18432 }
  0x28   : > { %p695_p4 = scmp.ne.s32.totalorder %s908_s16, %s694_s19  ;;  %p700_p1 = scmp.lt.s32.totalorder %s908_s16, %s1272_s0 }
  0x29   : > { %p701_p7 = scmp.lt.s32.totalorder %s699_s26, %s694_s19 }
  0x2a   : > { %p697_p11 = pnand %p696_p5, %p695_p4 }
  0x2b   : > { %p702_p8 = por %p701_p7, %p700_p1 }
  0x2c   : > { %p698_p12 = pneg %p697_p11 }
  0x2e   : > { %p703_p9 = pnand %p702_p8, %p698_p12 }
  0x30   : > { %706 = shalt.err (!%p703_p9)
}
  0x31   : > { %s707_s27 = scalar_lea.vmem %s903_s7, 9216  ;;  %s793_s3 = smov [#allocation2]  }
  0x32   : > { %p708_p10 = scmp.ne.s32.totalorder %s903_s7, %s707_s27  ;;  %s712_s4 = sshll.u32 %s793_s3, 4  ;;  %s713_s4 = int_to_ptr.vmem [resolvable:$false] %s712_s4 }
  0x33   : > { %s714_s5 = scalar_lea.vmem %s713_s4, 18432  ;;  %p715_p4 = scmp.lt.s32.totalorder %s903_s7, %s713_s4 }
  0x34   : > { %p710_p2 = pnand %p708_p10, %p696_p5  ;;  %p716_p11 = scmp.lt.s32.totalorder %s714_s5, %s707_s27 }
  0x36   : > { %p711_p0 = pneg %p710_p2  ;;  %p717_p6 = por %p716_p11, %p715_p4 }
  0x38   : > { %p718_p13 = pnand %p717_p6, %p711_p0 }
  0x3a   : > { %721 = shalt.err (!%p718_p13)
}
  0x3b   : > { %s794_s6 = smov 2304   ;;  %s795_s8 = smov 144  }
  0x3c   : > { %622 = dma.hbm_to_vmem [thread:$0]  (!%p891_p3), %s908_s16, 9216, %s903_s7, %s910_s17, %s794_s6, %s794_s6, %s795_s8  }
  0x3d   : > { %p1287_p5 = scmp.ne.s32.totalorder %s1283_s23, 0 }
  0x3e   : > { %s934_s14 = sand.u32 (!%p1287_p5), 1, %s782_s10   ;;  %p1288_p6 = scmp.ne.s32.totalorder (!%p1287_p5), %s1280_s20, 0 }
  0x3f   : > { %145 = sbr.rel (%p1287_p5) target bundleno = 132 (0x84), region = 28  ;;  %s148_s24 = scalar_lea.sflag (!%p1287_p5), [#allocation3], %s934_s14 }
  0x40   : > { %s605_s19 = smul.u32 (!%p1287_p5), 576, %s934_s14 }
  0x42   : > { %s940_s25 = scalar_lea.vmem (!%p1287_p5), [#allocation2], %s605_s19 }
  0x44   : > { %765 = dma.done.wait (%p1288_p6), %s148_s24, 9216  }
  0x45   : > { %767 = vsyncadd (%p1288_p6), %s148_s24, 4294958080  ;;  %p1289_p13 = scmp.eq.s32.totalorder %s835_s13, 0 }
  0x47   : > { %769 = dma.done.wait (%p1289_p13), [#allocation6], 288   ;;  %p1290_p3 = pmov %p1289_p13 }
  0x48   : > { %v256_v0 = vlaneseq  ;;  %v178_v10 = vld [vmem:[%s940_s25] sm:$0xff]  ;;  %v179_v12 = vld [vmem:[%s940_s25 + $0x8] sm:$0xff]  ;;  %v180_v15 = vld [vmem:[%s940_s25 + $0x10] sm:$0xff]  ;;  %vm435_vm0 = vcmask 89088   ;;  %s995_s20 = scalar_lea.vmem [#allocation7], %s605_s19  ;;  %s606_s23 = smul.u32 9216, %s835_s13 }
  0x49   : > { %771 = vsyncadd (%p1290_p3), [#allocation6], 4294967008  ;;  %v250_v11 = vld [vmem:[#allocation5] sm:$0xff]  ;;  %v181_v17 = vld [vmem:[%s940_s25 + $0x18] sm:$0xff]  ;;  %s506_s28 = sshll.u32 %s995_s20, 4  ;;  %s492_s26 = scalar_lea.sflag [#allocation4], %s934_s14  ;;  %s1209_s28 = int_to_ptr.vmem [resolvable:$true] %s506_s28 }
  0x4a   : > { %v257_v1 = vshrl.u32 %v256_v0, 7  ;;  %v182_v19 = vld [vmem:[%s940_s25 + $0x20] sm:$0xff]  ;;  %v183_v21 = vld [vmem:[%s940_s25 + $0x28] sm:$0xff]  ;;  %v184_v23 = vld [vmem:[%s940_s25 + $0x30] sm:$0xff]  ;;  %s1222_s17 = scalar_lea.hbm %s1274_s2, %s606_s23  ;;  %s722_s29 = scalar_lea.vmem %s1209_s28, 9216 }
  0x4b   : > { %v185_v25 = vld [vmem:[%s940_s25 + $0x38] sm:$0xff]  ;;  %v186_v31 = vld [vmem:[%s940_s25 + $0x40] sm:$0xff]  ;;  %v251_v32 = vld [vmem:[#allocation5 + $0x8] sm:$0xff]  ;;  %p723_p12 = scmp.ne.s32.totalorder %s1209_s28, %s722_s29  ;;  %p1291_p1 = scmp.ne.s32.totalorder %s1281_s21, 0 }
  0x4c   : > { %v950_v2 = vsub.s32 0, %v257_v1  ;;  %v952_v3 = vsub.s32 1, %v257_v1  ;;  %v266_v4 = vsub.s32 2, %v257_v1  ;;  %v270_v5 = vsub.s32 3, %v257_v1  ;;  %v187_v33 = vld [vmem:[%s940_s25 + $0x48] sm:$0xff]  ;;  %v188_v38 = vld [vmem:[%s940_s25 + $0x50] sm:$0xff] }
  0x4d   : > { %v274_v6 = vsub.s32 4, %v257_v1  ;;  %v278_v7 = vsub.s32 5, %v257_v1  ;;  %v282_v8 = vsub.s32 6, %v257_v1  ;;  %v286_v9 = vsub.s32 7, %v257_v1  ;;  %v189_v39 = vld [vmem:[%s940_s25 + $0x58] sm:$0xff]  ;;  %v190_v40 = vld [vmem:[%s940_s25 + $0x60] sm:$0xff]  ;;  %p724_p7 = pnand %p723_p12, %p1291_p1 }
  0x4e   : > { %v957_v13 = vrot.slane %v250_v11, %v950_v2  ;;  %v960_v14 = vrot.slane %v250_v11, %v952_v3  ;;  %v963_v16 = vrot.slane %v250_v11, %v266_v4  ;;  %v966_v18 = vrot.slane %v250_v11, %v270_v5  ;;  %v191_v45 = vld [vmem:[%s940_s25 + $0x68] sm:$0xff]  ;;  %v192_v46 = vld [vmem:[%s940_s25 + $0x70] sm:$0xff]  ;;  %v193_v47 = vld [vmem:[%s940_s25 + $0x78] sm:$0xff]  ;;  %s796_s13 = smov [#allocation7]  }
  0x4f   : > { %v969_v20 = vrot.slane %v250_v11, %v274_v6  ;;  %v972_v22 = vrot.slane %v250_v11, %v278_v7  ;;  %v975_v24 = vrot.slane %v250_v11, %v282_v8  ;;  %v978_v26 = vrot.slane %v250_v11, %v286_v9  ;;  %v194_v52 = vld [vmem:[%s940_s25 + $0x80] sm:$0xff]  ;;  %v252_v53 = vld [vmem:[#allocation5 + $0x10] sm:$0x3]  ;;  %v195_v54 = vld [vmem:[%s940_s25 + $0x88] sm:$0xff]  ;;  %p725_p8 = pneg %p724_p7  ;;  %s726_s30 = sshll.u32 %s796_s13, 4  ;;  %s727_s30 = int_to_ptr.vmem [resolvable:$false] %s726_s30 }
  0x50   : > { %v346_v27 = vadd.f32 %v957_v13, %v178_v10  ;;  %v347_v28 = vadd.f32 %v960_v14, %v179_v12  ;;  %v348_v29 = vadd.f32 %v963_v16, %v180_v15  ;;  %v349_v30 = vadd.f32 %v966_v18, %v181_v17  ;;  %v196_v59 = vld [vmem:[%s940_s25 + $0x90] sm:$0xff]  ;;  %v197_v60 = vld [vmem:[%s940_s25 + $0x98] sm:$0xff]  ;;  %v198_v61 = vld [vmem:[%s940_s25 + $0xa0] sm:$0xff]  ;;  %s728_s27 = scalar_lea.vmem %s727_s30, 18432  ;;  %p729_p9 = scmp.lt.s32.totalorder %s1209_s28, %s727_s30 }
  0x51   : > { %v350_v34 = vadd.f32 %v969_v20, %v182_v19  ;;  %v351_v35 = vadd.f32 %v972_v22, %v183_v21  ;;  %v352_v36 = vadd.f32 %v975_v24, %v184_v23  ;;  %v353_v37 = vadd.f32 %v978_v26, %v185_v25  ;;  %v202_v11 = vld [vmem:[%s940_s25 + $0xc0] sm:$0xff]  ;;  %v203_v12 = vld [vmem:[%s940_s25 + $0xc8] sm:$0xff]  ;;  %v204_v15 = vld [vmem:[%s940_s25 + $0xd0] sm:$0xff]  ;;  %p730_p10 = scmp.lt.s32.totalorder %s728_s27, %s722_s29 }
  0x52   : > { %418 = vst [vmem:[%s995_s20] sm:$0xff] %v346_v27  ;;  %419 = vst [vmem:[%s995_s20 + $0x8] sm:$0xff] %v347_v28  ;;  %v1002_v41 = vrot.slane %v251_v32, %v950_v2  ;;  %v1005_v42 = vrot.slane %v251_v32, %v952_v3  ;;  %v1007_v43 = vrot.slane %v251_v32, %v266_v4  ;;  %v199_v4 = vld [vmem:[%s940_s25 + $0xa8] sm:$0xff]  ;;  %v205_v21 = vld [vmem:[%s940_s25 + $0xd8] sm:$0xff] }
  0x53   : > { %420 = vst [vmem:[%s995_s20 + $0x10] sm:$0xff] %v348_v29  ;;  %421 = vst [vmem:[%s995_s20 + $0x18] sm:$0xff] %v349_v30  ;;  %v1009_v44 = vrot.slane %v251_v32, %v270_v5  ;;  %v1018_v48 = vrot.slane %v251_v32, %v274_v6  ;;  %v1020_v49 = vrot.slane %v251_v32, %v278_v7  ;;  %v200_v5 = vld [vmem:[%s940_s25 + $0xb0] sm:$0xff]  ;;  %v201_v6 = vld [vmem:[%s940_s25 + $0xb8] sm:$0xff]  ;;  %p731_p2 = por %p730_p10, %p729_p9 }
  0x54   : > { %422 = vst [vmem:[%s995_s20 + $0x20] sm:$0xff] %v350_v34  ;;  %423 = vst [vmem:[%s995_s20 + $0x28] sm:$0xff] %v351_v35  ;;  %v1022_v50 = vrot.slane %v251_v32, %v282_v8  ;;  %v1024_v51 = vrot.slane %v251_v32, %v286_v9  ;;  %v354_v55 = vadd.f32 %v1002_v41, %v186_v31  ;;  %v206_v23 = vld [vmem:[%s940_s25 + $0xe0] sm:$0xff]  ;;  %v207_v25 = vld [vmem:[%s940_s25 + $0xe8] sm:$0xff] }
  0x55   : > { %424 = vst [vmem:[%s995_s20 + $0x30] sm:$0xff] %v352_v36  ;;  %425 = vst [vmem:[%s995_s20 + $0x38] sm:$0xff] %v353_v37  ;;  %v355_v56 = vadd.f32 %v1005_v42, %v187_v33  ;;  %v356_v57 = vadd.f32 %v1007_v43, %v188_v38  ;;  %v357_v58 = vadd.f32 %v1009_v44, %v189_v39  ;;  %v208_v31 = vld [vmem:[%s940_s25 + $0xf0] sm:$0xff]  ;;  %v209_v32 = vld [vmem:[%s940_s25 + $0xf8] sm:$0xff]  ;;  %p732_p0 = pnand %p731_p2, %p725_p8 }
  0x56   : > { %v358_v62 = vadd.f32 %v1018_v48, %v190_v40  ;;  %v359_v63 = vadd.f32 %v1020_v49, %v191_v45  ;;  %v360_v0 = vadd.f32 %v1022_v50, %v192_v46  ;;  %v361_v1 = vadd.f32 %v1024_v51, %v193_v47  ;;  %426 = vst [vmem:[%s995_s20 + $0x40] sm:$0xff] %v354_v55  ;;  %v210_v33 = vld [vmem:[%s940_s25 + $0x100] sm:$0xff]  ;;  %v211_v38 = vld [vmem:[%s940_s25 + $0x108] sm:$0xff]  ;;  %v212_v39 = vld [vmem:[%s940_s25 + $0x110] sm:$0xff] }
  0x57   : > { %427 = vst [vmem:[%s995_s20 + $0x48] sm:$0xff] %v355_v56  ;;  %428 = vst [vmem:[%s995_s20 + $0x50] sm:$0xff] %v356_v57  ;;  %v1047_v7 = vrot.slane %v252_v53, %v950_v2  ;;  %v1050_v8 = vrot.slane %v252_v53, %v952_v3  ;;  %v364_v9 = vadd.f32 %v957_v13, %v196_v59  ;;  %v213_v40 = vld [vmem:[%s940_s25 + $0x118] sm:$0xff]  ;;  %v214_v53 = vld [vmem:[%s940_s25 + $0x120] sm:$0xff] }
  0x58   : > { %429 = vst [vmem:[%s995_s20 + $0x58] sm:$0xff] %v357_v58  ;;  %v365_v10 = vadd.f32 %v960_v14, %v197_v60  ;;  %430 = vst [vmem:[%s995_s20 + $0x60] sm:$0xff] %v358_v62  ;;  %v366_v2 = vadd.f32 %v963_v16, %v198_v61  ;;  %v367_v3 = vadd.f32 %v966_v18, %v199_v4  ;;  %v216_v55 = vld [vmem:[%s940_s25 + $0x130] sm:$0xff]  ;;  %v217_v60 = vld [vmem:[%s940_s25 + $0x138] sm:$0xff] }
  0x59   : > { %431 = vst [vmem:[%s995_s20 + $0x68] sm:$0xff] %v359_v63  ;;  %432 = vst [vmem:[%s995_s20 + $0x70] sm:$0xff] %v360_v0  ;;  %v368_v17 = vadd.f32 %v969_v20, %v200_v5  ;;  %v369_v19 = vadd.f32 %v972_v22, %v201_v6  ;;  %v362_v27 = vadd.f32 %v1047_v7, %v194_v52  ;;  %v218_v61 = vld [vmem:[%s940_s25 + $0x140] sm:$0xff]  ;;  %v219_v62 = vld [vmem:[%s940_s25 + $0x148] sm:$0xff] }
  0x5a   : > { %433 = vst [vmem:[%s995_s20 + $0x78] sm:$0xff] %v361_v1  ;;  %v363_v28 = vadd.f32 %v1050_v8, %v195_v54  ;;  %437 = vst [vmem:[%s995_s20 + $0x90] sm:$0xff] %v364_v9  ;;  %v370_v29 = vadd.f32 %v975_v24, %v202_v11  ;;  %v371_v30 = vadd.f32 %v978_v26, %v203_v12  ;;  %v215_v54 = vld [vmem:[%s940_s25 + $0x128] sm:$0xff]  ;;  %v220_v5 = vld [vmem:[%s940_s25 + $0x150] sm:$0xff] }
  0x5b   : > { %438 = vst [vmem:[%s995_s20 + $0x98] sm:$0xff] %v365_v10  ;;  %439 = vst [vmem:[%s995_s20 + $0xa0] sm:$0xff] %v366_v2  ;;  %v372_v34 = vadd.f32 %v1002_v41, %v204_v15  ;;  %v373_v35 = vadd.f32 %v1005_v42, %v205_v21  ;;  %v374_v36 = vadd.f32 %v1007_v43, %v206_v23  ;;  %v221_v6 = vld [vmem:[%s940_s25 + $0x158] sm:$0xff]  ;;  %v222_v9 = vld [vmem:[%s940_s25 + $0x160] sm:$0xff] }
  0x5c   : > { %440 = vst [vmem:[%s995_s20 + $0xa8] sm:$0xff] %v367_v3  ;;  %441 = vst [vmem:[%s995_s20 + $0xb0] sm:$0xff] %v368_v17  ;;  %v375_v37 = vadd.f32 %v1009_v44, %v207_v25  ;;  %v376_v45 = vadd.f32 %v1018_v48, %v208_v31  ;;  %v377_v46 = vadd.f32 %v1020_v49, %v209_v32  ;;  %v223_v15 = vld [vmem:[%s940_s25 + $0x168] sm:$0xff]  ;;  %v224_v2 = vld [vmem:[%s940_s25 + $0x170] sm:$0xff] }
  0x5d   : > { %442 = vst [vmem:[%s995_s20 + $0xb8] sm:$0xff] %v369_v19  ;;  %434 = vst [vmem:[%s995_s20 + $0x80] sm:$0xff] %v362_v27  ;;  %v378_v47 = vadd.f32 %v1022_v50, %v210_v33  ;;  %v379_v52 = vadd.f32 %v1024_v51, %v211_v38  ;;  %v380_v56 = vadd.f32 %v1047_v7, %v212_v39  ;;  %v225_v3 = vld [vmem:[%s940_s25 + $0x178] sm:$0xff]  ;;  %v226_v23 = vld [vmem:[%s940_s25 + $0x180] sm:$0xff] }
  0x5e   : > { %436 = vst.msk [vmem:[%s995_s20 + $0x88] sm:$0xff] %vm435_vm0, %v363_v28  ;;  %443 = vst [vmem:[%s995_s20 + $0xc0] sm:$0xff] %v370_v29  ;;  %v381_v57 = vadd.f32 %v1050_v8, %v213_v40  ;;  %v382_v58 = vadd.f32 %v957_v13, %v214_v53  ;;  %v383_v59 = vadd.f32 %v960_v14, %v215_v54  ;;  %v227_v25 = vld [vmem:[%s940_s25 + $0x188] sm:$0xff]  ;;  %v228_v27 = vld [vmem:[%s940_s25 + $0x190] sm:$0xff] }
  0x5f   : > { %444 = vst [vmem:[%s995_s20 + $0xc8] sm:$0xff] %v371_v30  ;;  %445 = vst [vmem:[%s995_s20 + $0xd0] sm:$0xff] %v372_v34  ;;  %v384_v63 = vadd.f32 %v963_v16, %v216_v55  ;;  %v385_v0 = vadd.f32 %v966_v18, %v217_v60  ;;  %v386_v1 = vadd.f32 %v969_v20, %v218_v61  ;;  %v229_v31 = vld [vmem:[%s940_s25 + $0x198] sm:$0xff]  ;;  %v230_v32 = vld [vmem:[%s940_s25 + $0x1a0] sm:$0xff] }
  0x60   : > { %446 = vst [vmem:[%s995_s20 + $0xd8] sm:$0xff] %v373_v35  ;;  %447 = vst [vmem:[%s995_s20 + $0xe0] sm:$0xff] %v374_v36  ;;  %v387_v4 = vadd.f32 %v972_v22, %v219_v62  ;;  %v388_v10 = vadd.f32 %v975_v24, %v220_v5  ;;  %v389_v11 = vadd.f32 %v978_v26, %v221_v6  ;;  %v231_v33 = vld [vmem:[%s940_s25 + $0x1a8] sm:$0xff]  ;;  %v233_v38 = vld [vmem:[%s940_s25 + $0x1b8] sm:$0xff] }
  0x61   : > { %448 = vst [vmem:[%s995_s20 + $0xe8] sm:$0xff] %v375_v37  ;;  %449 = vst [vmem:[%s995_s20 + $0xf0] sm:$0xff] %v376_v45  ;;  %v390_v12 = vadd.f32 %v1002_v41, %v222_v9  ;;  %v391_v17 = vadd.f32 %v1005_v42, %v223_v15  ;;  %v392_v19 = vadd.f32 %v1007_v43, %v224_v2  ;;  %v232_v37 = vld [vmem:[%s940_s25 + $0x1b0] sm:$0xff]  ;;  %v234_v39 = vld [vmem:[%s940_s25 + $0x1c0] sm:$0xff] }
  0x62   : > { %450 = vst [vmem:[%s995_s20 + $0xf8] sm:$0xff] %v377_v46  ;;  %451 = vst [vmem:[%s995_s20 + $0x100] sm:$0xff] %v378_v47  ;;  %v393_v21 = vadd.f32 %v1009_v44, %v225_v3  ;;  %v394_v28 = vadd.f32 %v1018_v48, %v226_v23  ;;  %v395_v29 = vadd.f32 %v1020_v49, %v227_v25  ;;  %v235_v47 = vld [vmem:[%s940_s25 + $0x1c8] sm:$0xff]  ;;  %v237_v53 = vld [vmem:[%s940_s25 + $0x1d8] sm:$0xff] }
  0x63   : > { %452 = vst [vmem:[%s995_s20 + $0x108] sm:$0xff] %v379_v52  ;;  %453 = vst [vmem:[%s995_s20 + $0x110] sm:$0xff] %v380_v56  ;;  %v396_v30 = vadd.f32 %v1022_v50, %v228_v27  ;;  %v397_v34 = vadd.f32 %v1024_v51, %v229_v31  ;;  %v398_v35 = vadd.f32 %v1047_v7, %v230_v32  ;;  %v236_v52 = vld [vmem:[%s940_s25 + $0x1d0] sm:$0xff]  ;;  %v239_v55 = vld [vmem:[%s940_s25 + $0x1e8] sm:$0xff] }
  0x64   : > { %454 = vst.msk [vmem:[%s995_s20 + $0x118] sm:$0xff] %vm435_vm0, %v381_v57  ;;  %455 = vst [vmem:[%s995_s20 + $0x120] sm:$0xff] %v382_v58  ;;  %v399_v36 = vadd.f32 %v1050_v8, %v231_v33  ;;  %v400_v40 = vadd.f32 %v957_v13, %v232_v37  ;;  %v401_v45 = vadd.f32 %v960_v14, %v233_v38  ;;  %v240_v56 = vld [vmem:[%s940_s25 + $0x1f0] sm:$0xff]  ;;  %v241_v57 = vld [vmem:[%s940_s25 + $0x1f8] sm:$0xff] }
  0x65   : > { %456 = vst [vmem:[%s995_s20 + $0x128] sm:$0xff] %v383_v59  ;;  %457 = vst [vmem:[%s995_s20 + $0x130] sm:$0xff] %v384_v63  ;;  %v402_v46 = vadd.f32 %v963_v16, %v234_v39  ;;  %v403_v54 = vadd.f32 %v966_v18, %v235_v47  ;;  %v404_v13 = vadd.f32 %v969_v20, %v236_v52  ;;  %v238_v16 = vld [vmem:[%s940_s25 + $0x1e0] sm:$0xff]  ;;  %v243_v59 = vld [vmem:[%s940_s25 + $0x208] sm:$0xff] }
  0x66   : > { %458 = vst [vmem:[%s995_s20 + $0x138] sm:$0xff] %v385_v0  ;;  %459 = vst [vmem:[%s995_s20 + $0x140] sm:$0xff] %v386_v1  ;;  %v405_v14 = vadd.f32 %v972_v22, %v237_v53  ;;  %v406_v18 = vadd.f32 %v975_v24, %v238_v16  ;;  %v407_v20 = vadd.f32 %v978_v26, %v239_v55  ;;  %v242_v58 = vld [vmem:[%s940_s25 + $0x200] sm:$0xff]  ;;  %v244_v61 = vld [vmem:[%s940_s25 + $0x210] sm:$0xff] }
  0x67   : > { %460 = vst [vmem:[%s995_s20 + $0x148] sm:$0xff] %v387_v4  ;;  %461 = vst [vmem:[%s995_s20 + $0x150] sm:$0xff] %v388_v10  ;;  %v408_v22 = vadd.f32 %v1002_v41, %v240_v56  ;;  %v409_v60 = vadd.f32 %v1005_v42, %v241_v57  ;;  %v410_v24 = vadd.f32 %v1007_v43, %v242_v58  ;;  %v245_v41 = vld [vmem:[%s940_s25 + $0x218] sm:$0xff]  ;;  %v246_v62 = vld [vmem:[%s940_s25 + $0x220] sm:$0xff] }
  0x68   : > { %462 = vst [vmem:[%s995_s20 + $0x158] sm:$0xff] %v389_v11  ;;  %463 = vst [vmem:[%s995_s20 + $0x160] sm:$0xff] %v390_v12  ;;  %v411_v26 = vadd.f32 %v1009_v44, %v243_v59  ;;  %v412_v63 = vadd.f32 %v1018_v48, %v244_v61  ;;  %v413_v42 = vadd.f32 %v1020_v49, %v245_v41  ;;  %v247_v44 = vld [vmem:[%s940_s25 + $0x228] sm:$0xff]  ;;  %v248_v0 = vld [vmem:[%s940_s25 + $0x230] sm:$0xff] }
  0x69   : > { %464 = vst [vmem:[%s995_s20 + $0x168] sm:$0xff] %v391_v17  ;;  %465 = vst [vmem:[%s995_s20 + $0x170] sm:$0xff] %v392_v19  ;;  %v414_v43 = vadd.f32 %v1022_v50, %v246_v62  ;;  %v249_v1 = vld [vmem:[%s940_s25 + $0x238] sm:$0xff]  ;;  %v415_v48 = vadd.f32 %v1024_v51, %v247_v44  ;;  %v416_v49 = vadd.f32 %v1047_v7, %v248_v0 }
  0x6a   : > { %466 = vst [vmem:[%s995_s20 + $0x178] sm:$0xff] %v393_v21  ;;  %467 = vst [vmem:[%s995_s20 + $0x180] sm:$0xff] %v394_v28  ;;  %v417_v50 = vadd.f32 %v1050_v8, %v249_v1 }
  0x6b   : > { %468 = vst [vmem:[%s995_s20 + $0x188] sm:$0xff] %v395_v29  ;;  %469 = vst [vmem:[%s995_s20 + $0x190] sm:$0xff] %v396_v30 }
  0x6c   : > { %470 = vst [vmem:[%s995_s20 + $0x198] sm:$0xff] %v397_v34  ;;  %471 = vst [vmem:[%s995_s20 + $0x1a0] sm:$0xff] %v398_v35 }
  0x6d   : > { %472 = vst.msk [vmem:[%s995_s20 + $0x1a8] sm:$0xff] %vm435_vm0, %v399_v36  ;;  %473 = vst [vmem:[%s995_s20 + $0x1b0] sm:$0xff] %v400_v40 }
  0x6e   : > { %474 = vst [vmem:[%s995_s20 + $0x1b8] sm:$0xff] %v401_v45  ;;  %475 = vst [vmem:[%s995_s20 + $0x1c0] sm:$0xff] %v402_v46 }
  0x6f   : > { %476 = vst [vmem:[%s995_s20 + $0x1c8] sm:$0xff] %v403_v54  ;;  %477 = vst [vmem:[%s995_s20 + $0x1d0] sm:$0xff] %v404_v13 }
  0x70   : > { %478 = vst [vmem:[%s995_s20 + $0x1d8] sm:$0xff] %v405_v14  ;;  %479 = vst [vmem:[%s995_s20 + $0x1e0] sm:$0xff] %v406_v18 }
  0x71   : > { %480 = vst [vmem:[%s995_s20 + $0x1e8] sm:$0xff] %v407_v20  ;;  %481 = vst [vmem:[%s995_s20 + $0x1f0] sm:$0xff] %v408_v22 }
  0x72   : > { %482 = vst [vmem:[%s995_s20 + $0x1f8] sm:$0xff] %v409_v60  ;;  %483 = vst [vmem:[%s995_s20 + $0x200] sm:$0xff] %v410_v24 }
  0x73   : > { %484 = vst [vmem:[%s995_s20 + $0x208] sm:$0xff] %v411_v26  ;;  %485 = vst [vmem:[%s995_s20 + $0x210] sm:$0xff] %v412_v63 }
  0x74   : > { %486 = vst [vmem:[%s995_s20 + $0x218] sm:$0xff] %v413_v42  ;;  %487 = vst [vmem:[%s995_s20 + $0x220] sm:$0xff] %v414_v43 }
  0x75   : > { %488 = vst [vmem:[%s995_s20 + $0x228] sm:$0xff] %v415_v48  ;;  %489 = vst [vmem:[%s995_s20 + $0x230] sm:$0xff] %v416_v49 }
  0x76   : > { %490 = vst.msk [vmem:[%s995_s20 + $0x238] sm:$0xff] %vm435_vm0, %v417_v50 }
  0x77   : > { %735 = shalt.err (!%p732_p0)
}
  0x78   : > { %s736_s3 = scalar_lea.hbm %s1222_s17, 9216  ;;  %s740_s6 = scalar_lea.hbm %s1274_s2, 18432 }
  0x79   : > { %p737_p4 = scmp.ne.s32.totalorder %s1222_s17, %s736_s3  ;;  %p741_p6 = scmp.lt.s32.totalorder %s1222_s17, %s1274_s2 }
  0x7a   : > { %p742_p13 = scmp.lt.s32.totalorder %s740_s6, %s736_s3 }
  0x7b   : > { %p738_p11 = pnand %p737_p4, %p1291_p1 }
  0x7c   : > { %p743_p3 = por %p742_p13, %p741_p6 }
  0x7d   : > { %p739_p5 = pneg %p738_p11 }
  0x7f   : > { %p744_p12 = pnand %p743_p3, %p739_p5 }
  0x81   : > { %747 = shalt.err (!%p744_p12)
}
  0x82   : > { %s797_s24 = smov 2304   ;;  %s798_s25 = smov 144  }
  0x83   : > { %613 = dma.vmem_to_hbm [thread:$0]  (%p1291_p1), %s1209_s28, 9216, %s1222_s17, %s492_s26, %s797_s24, %s797_s24, %s798_s25  }
  0x84 PF: > { %s521_s20 = sand.u32 1, %s778_s9   ;;  %p1292_p7 = scmp.ne.s32.totalorder %s1282_s22, 0 }
  0x85   : > { %p1293_p8 = scmp.ge.s32.totalorder %s790_s12, 2  ;;  %s522_s23 = scalar_lea.sflag [#allocation4], %s521_s20 }
  0x87   : > { %p624_p9 = pnand %p1293_p8, %p1292_p7 }
  0x89   : > { %p625_p10 = pneg %p624_p9 }
  0x8b   : > { %773 = dma.done.wait (%p625_p10), %s522_s23, 9216  }
  0x8c   : > { %775 = vsyncadd (%p625_p10), %s522_s23, 4294958080  ;;  %p16_p2 = scmp.ge.s32.totalorder %s839_s15, 4   ;;  %s1294_s9 = smov %s782_s10 }
  0x8d   : > { %s1295_s10 = smov %s786_s11  ;;  %s1296_s11 = smov %s851_s18 }
  0x8e   : > { %s1297_s12 = smov %s839_s15  ;;  %18 = sbr.rel (!%p16_p2) target bundleno = 6 (0x6), region = 77 }
  0x93   :  { %527 = vsyncpa [#allocation3], 1 }
  0x94   :  { %529 = vsyncpa [#allocation3 + $0x1], 1 }
  0x95   :  { %530 = vsyncpa [#allocation6], 1 }
  0x96   :  { %531 = vsyncpa [#allocation4], 1 }
  0x97   :  { %533 = vsyncpa [#allocation4 + $0x1], 1 }

</bundles_post_ra>
